<compile_context>
chip_gen: v7x
topology: tpu7x:2x2x1
jax: 0.10.0
libtpu: 0.0.40
codegen_flags: <defaults>
</compile_context>

<pallas_src>
import math

import jax
import jax.numpy as jnp
from jax.experimental import pallas as pl
from jax.experimental.pallas import tpu as pltpu

NUM_HEADS = 4
LANE = 128
TB_MAX = 1024          # batch-tile sweet spot (sweep 512..2048; keep mult of 8)


def _attention_fusion_kernel(img_ref, txt_ref,
                             wi_ref, bi_ref, wt_ref, bt_ref,
                             wqkv_ref, bqkv_ref, wo_ref, bo_ref,
                             hms_bd_ref, hmt_pm_ref,
                             out_ref):
    f32 = jnp.float32
    Hp = wo_ref.shape[0]
    TB = img_ref.shape[0]

    # Input projections (nn.Linear): x @ W^T + b (weights pre-transposed/padded).
    img_p = jnp.dot(img_ref[...], wi_ref[...], preferred_element_type=f32) + bi_ref[...]
    txt_p = jnp.dot(txt_ref[...], wt_ref[...], preferred_element_type=f32) + bt_ref[...]

    # Sublane-stack the two tokens -> ONE fused Q|K|V matmul (wqkv pushed to the
    # MXU once instead of twice).  TB is a multiple of 8, so the row split below
    # is sublane-tile aligned.
    x2 = jnp.concatenate([img_p, txt_p], axis=0)                        # (2TB, Hp)
    qkv = jnp.dot(x2, wqkv_ref[...], preferred_element_type=f32) + bqkv_ref[...]
    qkv0, qkv1 = qkv[:TB], qkv[TB:]                                     # img / txt

    # Static 128-aligned lane slices.
    q0, k0, v0 = qkv0[:, :Hp], qkv0[:, Hp:2 * Hp], qkv0[:, 2 * Hp:]
    q1, k1, v1 = qkv1[:, :Hp], qkv1[:, Hp:2 * Hp], qkv1[:, 2 * Hp:]

    # Attention scores, 4 matmuls folded into 1:
    #   d0 = s00 - s01 = (q0 * (k0 - k1)) @ hms        (1/sqrt(dh) in hms)
    #   d1 = s11 - s10 = (q1 * (k0 - k1)) @ (-hms)
    # One lane-concat LHS (K = 2*Hp = 256) against block-diag [[hms,0],[0,-hms]].
    kd = k0 - k1
    lhs = jnp.concatenate([q0 * kd, q1 * kd], axis=1)                   # (TB, 2Hp)
    d = jnp.dot(lhs, hms_bd_ref[...], preferred_element_type=f32)       # (TB, 2nh)

    # 2-way softmax in sigmoid form; exp saturation for extreme |d| resolves to
    # the correct 0/1 limit in f32 (no NaN).
    e = jax.nn.sigmoid(d)        # lanes [:nh] = a00, lanes [nh:] = a11

    # Head-broadcast of (a00 - a11) without lane slicing:  e @ [hmT; -hmT].
    wd = jnp.dot(e, hmt_pm_ref[...], preferred_element_type=f32)        # (TB, Hp)

    # mean over the 2 query tokens, folded algebraically:
    #   mean(o0, o1) = 0.5 * [(v0 + v1) + (a00 - a11)*(v0 - v1)]
    # (the 0.5 is folded into wo in the wrapper).
    attn2 = (v0 + v1) + wd * (v0 - v1)

    out_ref[...] = (jnp.dot(attn2, wo_ref[...], preferred_element_type=f32)
                    + bo_ref[...]).astype(out_ref.dtype)


def _pad2(x, shape):
    return jnp.pad(x, ((0, shape[0] - x.shape[0]), (0, shape[1] - x.shape[1])))


def _round_up(x, m):
    return -(-x // m) * m


def attention_fusion_pallas(image_features, text_features, params):
    B, Di = image_features.shape
    Dt = text_features.shape[1]
    H = params["out_proj_w"].shape[0]
    nh = NUM_HEADS
    dh = H // nh

    # Pad hidden dim to a lane-dense multiple of 128.
    Hp = _round_up(H, LANE)

    # --- wrapper-side constant folding (zero per-call kernel cost) -----------
    wi = _pad2(params["img_w"].T, (Di, Hp))                    # (Di, Hp)
    bi = _pad2(params["img_b"].reshape(1, H), (1, Hp))
    wt = _pad2(params["txt_w"].T, (Dt, Hp))                    # (Dt, Hp)
    bt = _pad2(params["txt_b"].reshape(1, H), (1, Hp))

    wq, wk, wv = jnp.split(params["in_proj_w"], 3, axis=0)     # (H, H) each
    bq, bk, bv = jnp.split(params["in_proj_b"], 3)
    wqkv = jnp.concatenate(
        [_pad2(wq.T, (Hp, Hp)), _pad2(wk.T, (Hp, Hp)), _pad2(wv.T, (Hp, Hp))],
        axis=1)                                                # (Hp, 3Hp)
    bqkv = jnp.concatenate(
        [_pad2(bq.reshape(1, H), (1, Hp)),
         _pad2(bk.reshape(1, H), (1, Hp)),
         _pad2(bv.reshape(1, H), (1, Hp))], axis=1)            # (1, 3Hp)

    # Token-mean 0.5 folded into the out-projection weight (bias unscaled).
    wo = 0.5 * _pad2(params["out_proj_w"].T, (Hp, Hp))         # (Hp, Hp)
    bo = _pad2(params["out_proj_b"].reshape(1, H), (1, Hp))

    # One-hot head membership hm[d, h] = 1 iff real feature d belongs to head h.
    d_idx = jnp.arange(Hp)
    hm = (((d_idx[:, None] // dh) == jnp.arange(nh)[None, :]) &
          (d_idx[:, None] < H)).astype(jnp.float32)            # (Hp, nh)
    hms = hm * (1.0 / math.sqrt(dh))                           # scale folded in
    z = jnp.zeros_like(hms)
    hms_bd = jnp.concatenate(                                  # (2Hp, 2nh)
        [jnp.concatenate([hms, z], axis=1),
         jnp.concatenate([z, -hms], axis=1)], axis=0)
    hmt_pm = jnp.concatenate([hm.T, -hm.T], axis=0)            # (2nh, Hp)

    # --- batch tiling ---------------------------------------------------------
    B8 = _round_up(B, 8)                 # keep all row splits 8-aligned
    num_tiles = -(-B8 // TB_MAX)
    if B8 >= 1024:
        num_tiles = max(num_tiles, 2)    # let v7x shard across both TensorCores
    TB = _round_up(-(-B8 // num_tiles), 8)
    Bp = num_tiles * TB
    if Bp != B:
        image_features = jnp.pad(image_features, ((0, Bp - B), (0, 0)))
        text_features = jnp.pad(text_features, ((0, Bp - B), (0, 0)))

    weights = (wi, bi, wt, bt, wqkv, bqkv, wo, bo, hms_bd, hmt_pm)

    out = pl.pallas_call(
        _attention_fusion_kernel,
        out_shape=jax.ShapeDtypeStruct((Bp, Hp), jnp.float32),
        grid=(num_tiles,),
        in_specs=[pl.BlockSpec((TB, Di), lambda i: (i, 0)),
                  pl.BlockSpec((TB, Dt), lambda i: (i, 0))]
                 + [pl.BlockSpec(w.shape, lambda i: (0, 0)) for w in weights],
        out_specs=pl.BlockSpec((TB, Hp), lambda i: (i, 0)),
        compiler_params=pltpu.CompilerParams(
            dimension_semantics=("parallel",),
            vmem_limit_bytes=48 * 1024 * 1024),
    )(image_features, text_features, *weights)

    return out[:B, :H]


def attention_fusion_reference(image_features, text_features, params):
    """Pure-JAX reference matching torch semantics (for correctness check)."""
    H = params["out_proj_w"].shape[0]
    nh, dh = NUM_HEADS, H // NUM_HEADS
    img_p = image_features @ params["img_w"].T + params["img_b"]
    txt_p = text_features @ params["txt_w"].T + params["txt_b"]
    x = jnp.stack([img_p, txt_p], axis=1)                      # (B, 2, H)
    wq, wk, wv = jnp.split(params["in_proj_w"], 3, axis=0)
    bq, bk, bv = jnp.split(params["in_proj_b"], 3)
    q = x @ wq.T + bq
    k = x @ wk.T + bk
    v = x @ wv.T + bv
    B = x.shape[0]
    q = q.reshape(B, 2, nh, dh).transpose(0, 2, 1, 3)
    k = k.reshape(B, 2, nh, dh).transpose(0, 2, 1, 3)
    v = v.reshape(B, 2, nh, dh).transpose(0, 2, 1, 3)
    s = jnp.einsum("bhqd,bhkd->bhqk", q, k) / math.sqrt(dh)
    a = jax.nn.softmax(s, axis=-1)
    o = jnp.einsum("bhqk,bhkd->bhqd", a, v).transpose(0, 2, 1, 3).reshape(B, 2, H)
    o = o @ params["out_proj_w"].T + params["out_proj_b"]
    return o.mean(axis=1)


if __name__ == "__main__":
    IMAGE_DIM, TEXT_DIM, HIDDEN = 16, 24, 32

    key = jax.random.PRNGKey(0)
    keys = jax.random.split(key, 10)

    # Deterministic synthetic parameters (PyTorch-convention shapes).
    params = {
        "img_w": 0.1 * jax.random.normal(keys[0], (HIDDEN, IMAGE_DIM), jnp.float32),
        "img_b": 0.1 * jax.random.normal(keys[1], (HIDDEN,), jnp.float32),
        "txt_w": 0.1 * jax.random.normal(keys[2], (HIDDEN, TEXT_DIM), jnp.float32),
        "txt_b": 0.1 * jax.random.normal(keys[3], (HIDDEN,), jnp.float32),
        "in_proj_w": 0.1 * jax.random.normal(keys[4], (3 * HIDDEN, HIDDEN), jnp.float32),
        "in_proj_b": 0.1 * jax.random.normal(keys[5], (3 * HIDDEN,), jnp.float32),
        "out_proj_w": 0.1 * jax.random.normal(keys[6], (HIDDEN, HIDDEN), jnp.float32),
        "out_proj_b": 0.1 * jax.random.normal(keys[7], (HIDDEN,), jnp.float32),
    }

    # Small-shape check (single tile, sub-8 batch padded to 8).
    B = 2
    image_features = jax.random.normal(keys[8], (B, IMAGE_DIM), jnp.float32)
    text_features = jax.random.normal(keys[9], (B, TEXT_DIM), jnp.float32)

    out = jax.block_until_ready(
        attention_fusion_pallas(image_features, text_features, params))
    ref = attention_fusion_reference(image_features, text_features, params)
    assert out.shape == (B, HIDDEN)
    assert jnp.allclose(out, ref, atol=1e-5, rtol=1e-5), (
        f"max abs err = {jnp.max(jnp.abs(out - ref))}")

    # Larger check (exercises single larger tile + non-pow2 batch).
    B2 = 520
    k1, k2 = jax.random.split(keys[8])
    img2 = jax.random.normal(k1, (B2, IMAGE_DIM), jnp.float32)
    txt2 = jax.random.normal(k2, (B2, TEXT_DIM), jnp.float32)
    out2 = jax.block_until_ready(attention_fusion_pallas(img2, txt2, params))
    ref2 = attention_fusion_reference(img2, txt2, params)
    assert out2.shape == (B2, HIDDEN)
    assert jnp.allclose(out2, ref2, atol=1e-5, rtol=1e-5), (
        f"max abs err = {jnp.max(jnp.abs(out2 - ref2))}")

    # Multi-tile check (batch tiling + padding + >=2 parallel grid steps).
    B3 = 1100
    k3, k4 = jax.random.split(k1)
    img3 = jax.random.normal(k3, (B3, IMAGE_DIM), jnp.float32)
    txt3 = jax.random.normal(k4, (B3, TEXT_DIM), jnp.float32)
    out3 = jax.block_until_ready(attention_fusion_pallas(img3, txt3, params))
    ref3 = attention_fusion_reference(img3, txt3, params)
    assert out3.shape == (B3, HIDDEN)
    assert jnp.allclose(out3, ref3, atol=1e-5, rtol=1e-5), (
        f"max abs err = {jnp.max(jnp.abs(out3 - ref3))}")

    print("KERNEL_OK")
</pallas_src>

<mosaic_0001>
module attributes {stable_mosaic.version = 11 : i64} {
  func.func @_attention_fusion_kernel(%arg0: i32, %arg1: memref<8x16xf32, #tpu.memory_space<vmem>>, %arg2: memref<8x24xf32, #tpu.memory_space<vmem>>, %arg3: memref<16x128xf32, #tpu.memory_space<vmem>>, %arg4: memref<1x128xf32, #tpu.memory_space<vmem>>, %arg5: memref<24x128xf32, #tpu.memory_space<vmem>>, %arg6: memref<1x128xf32, #tpu.memory_space<vmem>>, %arg7: memref<128x384xf32, #tpu.memory_space<vmem>>, %arg8: memref<1x384xf32, #tpu.memory_space<vmem>>, %arg9: memref<128x128xf32, #tpu.memory_space<vmem>>, %arg10: memref<1x128xf32, #tpu.memory_space<vmem>>, %arg11: memref<256x8xf32, #tpu.memory_space<vmem>>, %arg12: memref<8x128xf32, #tpu.memory_space<vmem>>, %arg13: memref<8x128xf32, #tpu.memory_space<vmem>>) attributes {dimension_semantics = [#tpu.dimension_semantics<parallel>], iteration_bounds = array<i64: 1>, scalar_prefetch = 0 : i64, scratch_operands = 0 : i64, tpu.core_type = #tpu.core_type<tc>, window_params = [{transform_indices = @transform_0, window_bounds = array<i64: 8, 16>}, {transform_indices = @transform_1, window_bounds = array<i64: 8, 24>}, {pipeline_mode = #tpu.pipeline_mode<synchronous>, transform_indices = @transform_2, window_bounds = array<i64: 16, 128>}, {pipeline_mode = #tpu.pipeline_mode<synchronous>, transform_indices = @transform_3, window_bounds = array<i64: 1, 128>}, {pipeline_mode = #tpu.pipeline_mode<synchronous>, transform_indices = @transform_4, window_bounds = array<i64: 24, 128>}, {pipeline_mode = #tpu.pipeline_mode<synchronous>, transform_indices = @transform_5, window_bounds = array<i64: 1, 128>}, {pipeline_mode = #tpu.pipeline_mode<synchronous>, transform_indices = @transform_6, window_bounds = array<i64: 128, 384>}, {pipeline_mode = #tpu.pipeline_mode<synchronous>, transform_indices = @transform_7, window_bounds = array<i64: 1, 384>}, {pipeline_mode = #tpu.pipeline_mode<synchronous>, transform_indices = @transform_8, window_bounds = array<i64: 128, 128>}, {pipeline_mode = #tpu.pipeline_mode<synchronous>, transform_indices = @transform_9, window_bounds = array<i64: 1, 128>}, {pipeline_mode = #tpu.pipeline_mode<synchronous>, transform_indices = @transform_10, window_bounds = array<i64: 256, 8>}, {pipeline_mode = #tpu.pipeline_mode<synchronous>, transform_indices = @transform_11, window_bounds = array<i64: 8, 128>}, {transform_indices = @transform_12, window_bounds = array<i64: 8, 128>}]} {
    %c0 = arith.constant 0 : index
    %c0_0 = arith.constant 0 : index
    %0 = vector.load %arg1[%c0, %c0_0] : memref<8x16xf32, #tpu.memory_space<vmem>>, vector<8x16xf32>
    %c0_1 = arith.constant 0 : index
    %c0_2 = arith.constant 0 : index
    %1 = vector.load %arg3[%c0_1, %c0_2] : memref<16x128xf32, #tpu.memory_space<vmem>>, vector<16x128xf32>
    %cst = arith.constant dense<0.000000e+00> : vector<8x128xf32>
    %2 = tpu.matmul %0, %1, %cst {dimension_numbers = #tpu.dot_dimension_numbers<[1], [0], [0], [1], [0, 0, 1, 1], [], []>} : vector<8x16xf32>, vector<16x128xf32>, vector<8x128xf32> -> vector<8x128xf32>
    %c0_3 = arith.constant 0 : index
    %c0_4 = arith.constant 0 : index
    %3 = vector.load %arg4[%c0_3, %c0_4] : memref<1x128xf32, #tpu.memory_space<vmem>>, vector<1x128xf32>
    %4 = vector.broadcast %3 : vector<1x128xf32> to vector<8x128xf32>
    %5 = arith.addf %2, %4 : vector<8x128xf32>
    %c0_5 = arith.constant 0 : index
    %c0_6 = arith.constant 0 : index
    %6 = vector.load %arg2[%c0_5, %c0_6] : memref<8x24xf32, #tpu.memory_space<vmem>>, vector<8x24xf32>
    %c0_7 = arith.constant 0 : index
    %c0_8 = arith.constant 0 : index
    %7 = vector.load %arg5[%c0_7, %c0_8] : memref<24x128xf32, #tpu.memory_space<vmem>>, vector<24x128xf32>
    %cst_9 = arith.constant dense<0.000000e+00> : vector<8x128xf32>
    %8 = tpu.matmul %6, %7, %cst_9 {dimension_numbers = #tpu.dot_dimension_numbers<[1], [0], [0], [1], [0, 0, 1, 1], [], []>} : vector<8x24xf32>, vector<24x128xf32>, vector<8x128xf32> -> vector<8x128xf32>
    %c0_10 = arith.constant 0 : index
    %c0_11 = arith.constant 0 : index
    %9 = vector.load %arg6[%c0_10, %c0_11] : memref<1x128xf32, #tpu.memory_space<vmem>>, vector<1x128xf32>
    %10 = vector.broadcast %9 : vector<1x128xf32> to vector<8x128xf32>
    %11 = arith.addf %8, %10 : vector<8x128xf32>
    %12 = tpu.concatenate %5, %11 in 0 : vector<8x128xf32>, vector<8x128xf32> -> vector<16x128xf32>
    %c0_12 = arith.constant 0 : index
    %c0_13 = arith.constant 0 : index
    %13 = vector.load %arg7[%c0_12, %c0_13] : memref<128x384xf32, #tpu.memory_space<vmem>>, vector<128x384xf32>
    %cst_14 = arith.constant dense<0.000000e+00> : vector<16x384xf32>
    %14 = tpu.matmul %12, %13, %cst_14 {dimension_numbers = #tpu.dot_dimension_numbers<[1], [0], [0], [1], [0, 0, 1, 1], [], []>} : vector<16x128xf32>, vector<128x384xf32>, vector<16x384xf32> -> vector<16x384xf32>
    %c0_15 = arith.constant 0 : index
    %c0_16 = arith.constant 0 : index
    %15 = vector.load %arg8[%c0_15, %c0_16] : memref<1x384xf32, #tpu.memory_space<vmem>>, vector<1x384xf32>
    %16 = vector.broadcast %15 : vector<1x384xf32> to vector<16x384xf32>
    %17 = arith.addf %14, %16 : vector<16x384xf32>
    %18 = vector.extract_strided_slice %17 {offsets = [0, 0], sizes = [8, 384], strides = [1, 1]} : vector<16x384xf32> to vector<8x384xf32>
    %19 = vector.extract_strided_slice %17 {offsets = [8, 0], sizes = [8, 384], strides = [1, 1]} : vector<16x384xf32> to vector<8x384xf32>
    %20 = vector.extract_strided_slice %18 {offsets = [0, 0], sizes = [8, 128], strides = [1, 1]} : vector<8x384xf32> to vector<8x128xf32>
    %21 = vector.extract_strided_slice %18 {offsets = [0, 128], sizes = [8, 128], strides = [1, 1]} : vector<8x384xf32> to vector<8x128xf32>
    %22 = vector.extract_strided_slice %18 {offsets = [0, 256], sizes = [8, 128], strides = [1, 1]} : vector<8x384xf32> to vector<8x128xf32>
    %23 = vector.extract_strided_slice %19 {offsets = [0, 0], sizes = [8, 128], strides = [1, 1]} : vector<8x384xf32> to vector<8x128xf32>
    %24 = vector.extract_strided_slice %19 {offsets = [0, 128], sizes = [8, 128], strides = [1, 1]} : vector<8x384xf32> to vector<8x128xf32>
    %25 = vector.extract_strided_slice %19 {offsets = [0, 256], sizes = [8, 128], strides = [1, 1]} : vector<8x384xf32> to vector<8x128xf32>
    %26 = arith.subf %21, %24 : vector<8x128xf32>
    %27 = arith.mulf %20, %26 : vector<8x128xf32>
    %28 = arith.mulf %23, %26 : vector<8x128xf32>
    %29 = tpu.concatenate %27, %28 in 1 : vector<8x128xf32>, vector<8x128xf32> -> vector<8x256xf32>
    %c0_17 = arith.constant 0 : index
    %c0_18 = arith.constant 0 : index
    %30 = vector.load %arg11[%c0_17, %c0_18] : memref<256x8xf32, #tpu.memory_space<vmem>>, vector<256x8xf32>
    %cst_19 = arith.constant dense<0.000000e+00> : vector<8x8xf32>
    %31 = tpu.matmul %29, %30, %cst_19 {dimension_numbers = #tpu.dot_dimension_numbers<[1], [0], [0], [1], [0, 0, 1, 1], [], []>} : vector<8x256xf32>, vector<256x8xf32>, vector<8x8xf32> -> vector<8x8xf32>
    %32 = arith.negf %31 : vector<8x8xf32>
    %33 = math.exp %32 : vector<8x8xf32>
    %cst_20 = arith.constant 1.000000e+00 : f32
    %34 = vector.broadcast %cst_20 : f32 to vector<8x8xf32>
    %35 = arith.addf %34, %33 : vector<8x8xf32>
    %36 = arith.divf %34, %35 : vector<8x8xf32>
    %c0_21 = arith.constant 0 : index
    %c0_22 = arith.constant 0 : index
    %37 = vector.load %arg12[%c0_21, %c0_22] : memref<8x128xf32, #tpu.memory_space<vmem>>, vector<8x128xf32>
    %cst_23 = arith.constant dense<0.000000e+00> : vector<8x128xf32>
    %38 = tpu.matmul %36, %37, %cst_23 {dimension_numbers = #tpu.dot_dimension_numbers<[1], [0], [0], [1], [0, 0, 1, 1], [], []>} : vector<8x8xf32>, vector<8x128xf32>, vector<8x128xf32> -> vector<8x128xf32>
    %39 = arith.addf %22, %25 : vector<8x128xf32>
    %40 = arith.subf %22, %25 : vector<8x128xf32>
    %41 = arith.mulf %38, %40 : vector<8x128xf32>
    %42 = arith.addf %39, %41 : vector<8x128xf32>
    %c0_24 = arith.constant 0 : index
    %c0_25 = arith.constant 0 : index
    %43 = vector.load %arg9[%c0_24, %c0_25] : memref<128x128xf32, #tpu.memory_space<vmem>>, vector<128x128xf32>
    %cst_26 = arith.constant dense<0.000000e+00> : vector<8x128xf32>
    %44 = tpu.matmul %42, %43, %cst_26 {dimension_numbers = #tpu.dot_dimension_numbers<[1], [0], [0], [1], [0, 0, 1, 1], [], []>} : vector<8x128xf32>, vector<128x128xf32>, vector<8x128xf32> -> vector<8x128xf32>
    %c0_27 = arith.constant 0 : index
    %c0_28 = arith.constant 0 : index
    %45 = vector.load %arg10[%c0_27, %c0_28] : memref<1x128xf32, #tpu.memory_space<vmem>>, vector<1x128xf32>
    %46 = vector.broadcast %45 : vector<1x128xf32> to vector<8x128xf32>
    %47 = arith.addf %44, %46 : vector<8x128xf32>
    %c0_29 = arith.constant 0 : index
    %c0_30 = arith.constant 0 : index
    %48 = vector.load %arg13[%c0_29, %c0_30] : memref<8x128xf32, #tpu.memory_space<vmem>>, vector<8x128xf32>
    tpu.vector_store %arg13[%c0_29, %c0_30], %47 {strides = array<i32>} : memref<8x128xf32, #tpu.memory_space<vmem>>, vector<8x128xf32>,
    return
  }
  func.func @transform_0(%arg0: i32) -> (i32, i32) {
    %c0_i32 = arith.constant 0 : i32
    %c0_i32_0 = arith.constant 0 : i32
    return %arg0, %c0_i32 : i32, i32
  }
  func.func @transform_1(%arg0: i32) -> (i32, i32) {
    %c0_i32 = arith.constant 0 : i32
    %c0_i32_0 = arith.constant 0 : i32
    return %arg0, %c0_i32 : i32, i32
  }
  func.func @transform_2(%arg0: i32) -> (i32, i32) {
    %c0_i32 = arith.constant 0 : i32
    %c0_i32_0 = arith.constant 0 : i32
    %c0_i32_1 = arith.constant 0 : i32
    return %c0_i32, %c0_i32_0 : i32, i32
  }
  func.func @transform_3(%arg0: i32) -> (i32, i32) {
    %c0_i32 = arith.constant 0 : i32
    %c0_i32_0 = arith.constant 0 : i32
    %c0_i32_1 = arith.constant 0 : i32
    return %c0_i32, %c0_i32_0 : i32, i32
  }
  func.func @transform_4(%arg0: i32) -> (i32, i32) {
    %c0_i32 = arith.constant 0 : i32
    %c0_i32_0 = arith.constant 0 : i32
    %c0_i32_1 = arith.constant 0 : i32
    return %c0_i32, %c0_i32_0 : i32, i32
  }
  func.func @transform_5(%arg0: i32) -> (i32, i32) {
    %c0_i32 = arith.constant 0 : i32
    %c0_i32_0 = arith.constant 0 : i32
    %c0_i32_1 = arith.constant 0 : i32
    return %c0_i32, %c0_i32_0 : i32, i32
  }
  func.func @transform_6(%arg0: i32) -> (i32, i32) {
    %c0_i32 = arith.constant 0 : i32
    %c0_i32_0 = arith.constant 0 : i32
    %c0_i32_1 = arith.constant 0 : i32
    return %c0_i32, %c0_i32_0 : i32, i32
  }
  func.func @transform_7(%arg0: i32) -> (i32, i32) {
    %c0_i32 = arith.constant 0 : i32
    %c0_i32_0 = arith.constant 0 : i32
    %c0_i32_1 = arith.constant 0 : i32
    return %c0_i32, %c0_i32_0 : i32, i32
  }
  func.func @transform_8(%arg0: i32) -> (i32, i32) {
    %c0_i32 = arith.constant 0 : i32
    %c0_i32_0 = arith.constant 0 : i32
    %c0_i32_1 = arith.constant 0 : i32
    return %c0_i32, %c0_i32_0 : i32, i32
  }
  func.func @transform_9(%arg0: i32) -> (i32, i32) {
    %c0_i32 = arith.constant 0 : i32
    %c0_i32_0 = arith.constant 0 : i32
    %c0_i32_1 = arith.constant 0 : i32
    return %c0_i32, %c0_i32_0 : i32, i32
  }
  func.func @transform_10(%arg0: i32) -> (i32, i32) {
    %c0_i32 = arith.constant 0 : i32
    %c0_i32_0 = arith.constant 0 : i32
    %c0_i32_1 = arith.constant 0 : i32
    return %c0_i32, %c0_i32_0 : i32, i32
  }
  func.func @transform_11(%arg0: i32) -> (i32, i32) {
    %c0_i32 = arith.constant 0 : i32
    %c0_i32_0 = arith.constant 0 : i32
    %c0_i32_1 = arith.constant 0 : i32
    return %c0_i32, %c0_i32_0 : i32, i32
  }
  func.func @transform_12(%arg0: i32) -> (i32, i32) {
    %c0_i32 = arith.constant 0 : i32
    %c0_i32_0 = arith.constant 0 : i32
    return %arg0, %c0_i32 : i32, i32
  }
}

</mosaic_0001>

<bundles_post_ra>
// kernel: tpu_custom_call.1
= control target key start
LH: loop header
LB: loop body
LE: loop exit
PB: predicated region body
PF: predicated region fallthrough
CT: control target
= control target key end

     0   :  { %17 = vsyncpa [#allocation3], 0  ;;  %s1413_s0 = inlined_call_operand.vmem [shape: f32[8,16], index: 0, kind: input, shape index: {}]   ;;  %s1414_s1 = inlined_call_operand.vmem [shape: f32[8,24], index: 1, kind: input, shape index: {}]   ;;  %s1415_s2 = inlined_call_operand.vmem [shape: f32[16,128], index: 2, kind: input, shape index: {}]   ;;  %s1416_s3 = inlined_call_operand.vmem [shape: f32[1,128], index: 3, kind: input, shape index: {}]   ;;  %s1417_s4 = inlined_call_operand.vmem [shape: f32[24,128], index: 4, kind: input, shape index: {}]   ;;  %s1418_s5 = inlined_call_operand.vmem [shape: f32[1,128], index: 5, kind: input, shape index: {}]   ;;  %s1419_s6 = inlined_call_operand.hbm [shape: f32[128,384], index: 6, kind: input, shape index: {}]   ;;  %s1420_s7 = inlined_call_operand.vmem [shape: f32[1,384], index: 7, kind: input, shape index: {}]   ;;  %s1421_s8 = inlined_call_operand.vmem [shape: f32[128,128], index: 8, kind: input, shape index: {}]   ;;  %s1422_s9 = inlined_call_operand.vmem [shape: f32[1,128], index: 9, kind: input, shape index: {}]   ;;  %s1423_s10 = inlined_call_operand.vmem [shape: f32[256,8], index: 10, kind: input, shape index: {}]   ;;  %s1424_s11 = inlined_call_operand.vmem [shape: f32[8,128], index: 11, kind: input, shape index: {}]   ;;  %s1425_s12 = inlined_call_operand.hbm [shape: f32[8,128], index: 12, kind: output, shape index: {}]  }
   0x1   :  { %18 = vsyncpa [#allocation4], 0  ;;  %s1103_s21 = smov [#allocation2]   ;;  %s1055_s25 = scalar_lea.hbm %s1419_s6, 6144 }
   0x2   :  { %s36_s22 = sshll.u32 %s1103_s21, 4  ;;  %p1056_p0 = scmp.ne.s32.totalorder %s1419_s6, %s1055_s25  ;;  %s37_s22 = int_to_ptr.vmem [resolvable:$true] %s36_s22 }
   0x3   :  { %p1059_p1 = scmp.lt.u32.totalorder %s1055_s25, %s1419_s6 }
   0x5   :  { %p1061_p2 = pnand %p1059_p1, %p1056_p0 }
   0x7   :  { %1064 = shalt.err (!%p1061_p2)
}
   0x8   :  { %s1065_s30 = scalar_lea.vmem %s37_s22, 6144  ;;  %p1070_p4 = scmp.lt.s32.totalorder %s37_s22, %s37_s22 }
   0x9   :  { %p1066_p3 = scmp.ne.s32.totalorder %s37_s22, %s1065_s30  ;;  %p1071_p5 = scmp.lt.s32.totalorder %s1065_s30, %s1065_s30 }
   0xb   :  { %p1072_p6 = por %p1071_p5, %p1070_p4 }
   0xd   :  { %p1073_p7 = pnand %p1072_p6, %p1066_p3 }
   0xf   :  { %1076 = shalt.err (!%p1073_p7)
}
  0x10   :  { %s1104_s13 = smov 384   ;;  %s1105_s14 = smov 24  }
  0x11   :  { %42 = dma.hbm_to_vmem [thread:$0]  %s1419_s6, 6144, %s37_s22, [#allocation3], %s1104_s13, %s1104_s13, %s1105_s14  }
  0x12   :  { %1099 = dma.done.wait [#allocation3], 6144  }
  0x13   :  { %1100 = vsyncadd [#allocation3], 4294961152  ;;  %v1106_v0 = vmov 0.0|0.0   ;;  %vm1107_vm0 = vmmov 0   ;;  %v1108_v1 = vmov 0.0   ;;  %v57_v2 = vld [vmem:[%s1415_s2] sm:$0xff] }
  0x14   :  { %918 = vmatprep.subr.bf16.mxu0 %v1106_v0  ;;  %921 = vmatprep.subr.bf16.mxu1 %v1106_v0  ;;  %v58_v3 = vld [vmem:[%s1415_s2 + $0x8] sm:$0xff]  ;;  %v141_v4 = vld [vmem:[%s1417_s4] sm:$0xff]  ;;  %vm66_vm1 = vcmask 130048   ;;  %v143_v11 = vld [vmem:[%s1417_s4 + $0x10] sm:$0xff]  ;;  %vm151_vm2 = vcmask 195584   ;;  %vm554_vm3 = vcmask 64512  }
  0x15   :  { %831 = vmatprep.mubr.msk.f32.mxu0 %vm1107_vm0, %v1108_v1  ;;  %840 = vmatprep.mubr.msk.f32.mxu1 %vm1107_vm0, %v1108_v1  ;;  %v919_v5 = vpack.c.bf16 %v58_v3, %v57_v2  ;;  %v142_v6 = vld [vmem:[%s1417_s4 + $0x8] sm:$0xff]  ;;  %v56_v8 = vld [vmem:[%s1413_s0] sm:$0xff]  ;;  %v228_v14 = vld [vmem:[#allocation2 + $0x18] sm:$0xff] }
  0x16   :  { %v922_v7 = vpack.c.bf16 %v142_v6, %v141_v4  ;;  %v226_v9 = vld [vmem:[#allocation2 + $0x8] sm:$0xff]  ;;  %v229_v10 = vld [vmem:[#allocation2 + $0x20] sm:$0xff]  ;;  %v227_v15 = vld [vmem:[#allocation2 + $0x10] sm:$0xff] }
  0x17   :  { %920 = vmatpush3.bf16.msra.mxu0 %v919_v5  ;;  %v924_v12 = vpack.c.bf16 %v229_v10, %v226_v9  ;;  %v225_v13 = vld [vmem:[#allocation2] sm:$0xff]  ;;  %v230_v18 = vld [vmem:[#allocation2 + $0x28] sm:$0xff]  ;;  %v232_v19 = vld [vmem:[#allocation2 + $0x38] sm:$0xff] }
  0x18   :  { %923 = vmatpush3.bf16.msra.mxu1 %v922_v7  ;;  %v140_v16 = vld [vmem:[%s1414_s1] sm:$0xff]  ;;  %v926_v17 = vpack.c.bf16 %v228_v14, %v225_v13  ;;  %v235_v20 = vld [vmem:[#allocation2 + $0x50] sm:$0xff]  ;;  %v956_v21 = vpack.c.bf16 %v230_v18, %v227_v15  ;;  %v234_v24 = vld [vmem:[#allocation2 + $0x48] sm:$0xff]  ;;  %s1109_s1 = smov [#allocation5]  }
  0x19   :  { %838 = vmatprep.subr.mxu1 %v1108_v1  ;;  %925 = vmatprep.subr.bf16.mxu0 %v924_v12  ;;  %v928_v22 = vpack.c.bf16 %v235_v20, %v232_v19  ;;  %v231_v23 = vld [vmem:[#allocation2 + $0x30] sm:$0xff]  ;;  %v233_v25 = vld [vmem:[#allocation2 + $0x40] sm:$0xff]  ;;  %v236_v26 = vld [vmem:[#allocation2 + $0x58] sm:$0xff]  ;;  %s732_s4 = sshll.u32 %s1109_s1, 4  ;;  %s733_s4 = int_to_ptr.vmem [resolvable:$true] %s732_s4 }
  0x1a   :  { %832 = vmatmul.mubr.msk.f32.vlgmr.msra.gmra.mrb[0].mxu0 %vm66_vm1, %v56_v8  ;;  %v238_v27 = vld [vmem:[#allocation2 + $0x68] sm:$0xff]  ;;  %v241_v28 = vld [vmem:[#allocation2 + $0x80] sm:$0xff]  ;;  %v930_v29 = vpack.c.bf16 %v234_v24, %v231_v23  ;;  %v960_v30 = vpack.c.bf16 %v236_v26, %v233_v25  ;;  %v240_v33 = vld [vmem:[#allocation2 + $0x78] sm:$0xff]  ;;  %p1082_p9 = scmp.lt.s32.totalorder %s733_s4, %s733_s4 }
  0x1b   :  { %927 = vmatpush1.bf16.msra.mxu0 %v926_v17  ;;  %v237_v31 = vld [vmem:[#allocation2 + $0x60] sm:$0xff]  ;;  %354 = vmatprep.mubr.f32.mxu0 %v1108_v1  ;;  %v932_v32 = vpack.c.bf16 %v241_v28, %v238_v27  ;;  %v239_v34 = vld [vmem:[#allocation2 + $0x70] sm:$0xff]  ;;  %v242_v35 = vld [vmem:[#allocation2 + $0x88] sm:$0xff] }
  0x1c   :  { %839 = vmatpush3.msra.mxu1 %v143_v11  ;;  %929 = vmatprep.subr.bf16.mxu0 %v928_v22  ;;  %v244_v36 = vld [vmem:[#allocation2 + $0x98] sm:$0xff]  ;;  %v247_v37 = vld [vmem:[#allocation2 + $0xb0] sm:$0xff]  ;;  %v934_v38 = vpack.c.bf16 %v240_v33, %v237_v31  ;;  %v964_v39 = vpack.c.bf16 %v242_v35, %v239_v34  ;;  %v246_v42 = vld [vmem:[#allocation2 + $0xa8] sm:$0xff] }
  0x1d   :  { %841 = vmatmul.mubr.msk.f32.vlgmr.msra.gmra.mrb[0].mxu1 %vm151_vm2, %v140_v16  ;;  %957 = vmatprep.subr.bf16.mxu1 %v956_v21  ;;  %v243_v40 = vld [vmem:[#allocation2 + $0x90] sm:$0xff]  ;;  %v936_v41 = vpack.c.bf16 %v247_v37, %v244_v36  ;;  %v245_v43 = vld [vmem:[#allocation2 + $0xa0] sm:$0xff]  ;;  %v248_v44 = vld [vmem:[#allocation2 + $0xb8] sm:$0xff] }
  0x1e   :  { %959 = vmatpush3.bf16.msra.mxu1 %v956_v21  ;;  %v250_v45 = vld [vmem:[#allocation2 + $0xc8] sm:$0xff]  ;;  %v253_v46 = vld [vmem:[#allocation2 + $0xe0] sm:$0xff]  ;;  %v938_v47 = vpack.c.bf16 %v246_v42, %v243_v40  ;;  %v968_v48 = vpack.c.bf16 %v248_v44, %v245_v43  ;;  %v252_v51 = vld [vmem:[#allocation2 + $0xd8] sm:$0xff] }
  0x1f   :  { %931 = vmatpush1.bf16.msra.mxu0 %v930_v29  ;;  %961 = vmatprep.subr.bf16.mxu1 %v960_v30  ;;  %v249_v49 = vld [vmem:[#allocation2 + $0xc0] sm:$0xff]  ;;  %v940_v50 = vpack.c.bf16 %v253_v46, %v250_v45  ;;  %v251_v52 = vld [vmem:[#allocation2 + $0xd0] sm:$0xff]  ;;  %v254_v53 = vld [vmem:[#allocation2 + $0xe8] sm:$0xff] }
  0x20   :  { %933 = vmatprep.subr.bf16.mxu0 %v932_v32  ;;  %v256_v54 = vld [vmem:[#allocation2 + $0xf8] sm:$0xff]  ;;  %v259_v55 = vld [vmem:[#allocation2 + $0x110] sm:$0xff]  ;;  %v942_v56 = vpack.c.bf16 %v252_v51, %v249_v49  ;;  %v972_v57 = vpack.c.bf16 %v254_v53, %v251_v52  ;;  %v258_v60 = vld [vmem:[#allocation2 + $0x108] sm:$0xff] }
  0x21   :  { %v255_v58 = vld [vmem:[#allocation2 + $0xf0] sm:$0xff]  ;;  %v944_v59 = vpack.c.bf16 %v259_v55, %v256_v54  ;;  %v257_v61 = vld [vmem:[#allocation2 + $0x100] sm:$0xff]  ;;  %v260_v62 = vld [vmem:[#allocation2 + $0x118] sm:$0xff] }
  0x22   :  { %963 = vmatpush3.bf16.msra.mxu1 %v960_v30  ;;  %v262_v63 = vld [vmem:[#allocation2 + $0x128] sm:$0xff]  ;;  %v265_v2 = vld [vmem:[#allocation2 + $0x140] sm:$0xff]  ;;  %v946_v3 = vpack.c.bf16 %v258_v60, %v255_v58  ;;  %v976_v4 = vpack.c.bf16 %v260_v62, %v257_v61  ;;  %v264_v7 = vld [vmem:[#allocation2 + $0x138] sm:$0xff] }
  0x23   :  { %935 = vmatpush1.bf16.msra.mxu0 %v934_v38  ;;  %965 = vmatprep.subr.bf16.mxu1 %v964_v39  ;;  %v261_v5 = vld [vmem:[#allocation2 + $0x120] sm:$0xff]  ;;  %v948_v6 = vpack.c.bf16 %v265_v2, %v262_v63  ;;  %v263_v8 = vld [vmem:[#allocation2 + $0x130] sm:$0xff]  ;;  %v266_v9 = vld [vmem:[#allocation2 + $0x148] sm:$0xff] }
  0x24   :  { %937 = vmatprep.subr.bf16.mxu0 %v936_v41  ;;  %v268_v10 = vld [vmem:[#allocation2 + $0x158] sm:$0xff]  ;;  %v271_v11 = vld [vmem:[#allocation2 + $0x170] sm:$0xff]  ;;  %v950_v12 = vpack.c.bf16 %v264_v7, %v261_v5  ;;  %v980_v13 = vpack.c.bf16 %v266_v9, %v263_v8  ;;  %v270_v16 = vld [vmem:[#allocation2 + $0x168] sm:$0xff] }
  0x25   :  { %v952_v14 = vpack.c.bf16 %v271_v11, %v268_v10  ;;  %v267_v15 = vld [vmem:[#allocation2 + $0x150] sm:$0xff]  ;;  %v269_v18 = vld [vmem:[#allocation2 + $0x160] sm:$0xff]  ;;  %v272_v19 = vld [vmem:[#allocation2 + $0x178] sm:$0xff] }
  0x26   :  { %967 = vmatpush3.bf16.msra.mxu1 %v964_v39  ;;  %v954_v17 = vpack.c.bf16 %v270_v16, %v267_v15  ;;  %v984_v20 = vpack.c.bf16 %v272_v19, %v269_v18  ;;  %v461_v21 = vld [vmem:[%s1423_s10 + $0x80] sm:$0xff]  ;;  %v462_v22 = vld [vmem:[%s1423_s10 + $0x88] sm:$0xff]  ;;  %v463_v27 = vld [vmem:[%s1423_s10 + $0x90] sm:$0xff]  ;;  %v275_v15 = vlaneseq }
  0x27   :  { %939 = vmatpush1.bf16.msra.mxu0 %v938_v47  ;;  %969 = vmatprep.subr.bf16.mxu1 %v968_v48  ;;  %v988_v23 = vpack.c.bf16 %v462_v22, %v461_v21  ;;  %v445_v24 = vld [vmem:[%s1423_s10] sm:$0xff]  ;;  %v446_v25 = vld [vmem:[%s1423_s10 + $0x8] sm:$0xff]  ;;  %v464_v28 = vld [vmem:[%s1423_s10 + $0x98] sm:$0xff] }
  0x28   :  { %941 = vmatprep.subr.bf16.mxu0 %v940_v50  ;;  %v741_v26 = vld [vmem:[%s1416_s3] ss:$0 sm:$0xff]  ;;  %v990_v30 = vpack.c.bf16 %v446_v25, %v445_v24  ;;  %v992_v34 = vpack.c.bf16 %v464_v28, %v463_v27  ;;  %v447_v35 = vld [vmem:[%s1423_s10 + $0x10] sm:$0xff]  ;;  %v448_v36 = vld [vmem:[%s1423_s10 + $0x18] sm:$0xff]  ;;  %v276_v16 = vshrl.u32 %v275_v15, 7 }
  0x29   :  { %v743_v33 = vld [vmem:[%s1418_s5] ss:$0 sm:$0xff]  ;;  %v466_v38 = vld [vmem:[%s1423_s10 + $0xa8] sm:$0xff]  ;;  %v994_v42 = vpack.c.bf16 %v448_v36, %v447_v35  ;;  %v467_v46 = vld [vmem:[%s1423_s10 + $0xb0] sm:$0xff] }
  0x2a   :  { %971 = vmatpush3.bf16.msra.mxu1 %v968_v48  ;;  %v465_v37 = vld [vmem:[%s1423_s10 + $0xa0] sm:$0xff]  ;;  %v450_v45 = vld [vmem:[%s1423_s10 + $0x28] sm:$0xff]  ;;  %v468_v47 = vld [vmem:[%s1423_s10 + $0xb8] sm:$0xff]  ;;  %v281_v18 = vsub.s32 1, %v276_v16 }
  0x2b   :  { %943 = vmatpush1.bf16.msra.mxu0 %v942_v56  ;;  %973 = vmatprep.subr.bf16.mxu1 %v972_v57  ;;  %v996_v43 = vpack.c.bf16 %v466_v38, %v465_v37  ;;  %v449_v44 = vld [vmem:[%s1423_s10 + $0x20] sm:$0xff]  ;;  %v1000_v49 = vpack.c.bf16 %v468_v47, %v467_v46  ;;  %v451_v50 = vld [vmem:[%s1423_s10 + $0x30] sm:$0xff]  ;;  %v452_v51 = vld [vmem:[%s1423_s10 + $0x38] sm:$0xff] }
  0x2c   :  { %945 = vmatprep.subr.bf16.mxu0 %v944_v59  ;;  %v998_v48 = vpack.c.bf16 %v450_v45, %v449_v44  ;;  %v469_v52 = vld [vmem:[%s1423_s10 + $0xc0] sm:$0xff]  ;;  %v470_v53 = vld [vmem:[%s1423_s10 + $0xc8] sm:$0xff]  ;;  %v1002_v54 = vpack.c.bf16 %v452_v51, %v451_v50  ;;  %v471_v59 = vld [vmem:[%s1423_s10 + $0xd0] sm:$0xff] }
  0x2d   :  { %v1004_v55 = vpack.c.bf16 %v470_v53, %v469_v52  ;;  %v453_v56 = vld [vmem:[%s1423_s10 + $0x40] sm:$0xff]  ;;  %v472_v60 = vld [vmem:[%s1423_s10 + $0xd8] sm:$0xff]  ;;  %v455_v62 = vld [vmem:[%s1423_s10 + $0x50] sm:$0xff] }
  0x2e   :  { %975 = vmatpush3.bf16.msra.mxu1 %v972_v57  ;;  %v454_v57 = vld [vmem:[%s1423_s10 + $0x48] sm:$0xff]  ;;  %v1008_v61 = vpack.c.bf16 %v472_v60, %v471_v59  ;;  %v456_v63 = vld [vmem:[%s1423_s10 + $0x58] sm:$0xff]  ;;  %v475_v9 = vld [vmem:[%s1423_s10 + $0xf0] sm:$0xff] }
  0x2f   :  { %947 = vmatpush1.bf16.msra.mxu0 %v946_v3  ;;  %977 = vmatprep.subr.bf16.mxu1 %v976_v4  ;;  %v1006_v58 = vpack.c.bf16 %v454_v57, %v453_v56  ;;  %v1010_v2 = vpack.c.bf16 %v456_v63, %v455_v62  ;;  %v473_v3 = vld [vmem:[%s1423_s10 + $0xe0] sm:$0xff]  ;;  %v458_v7 = vld [vmem:[%s1423_s10 + $0x68] sm:$0xff]  ;;  %v476_v10 = vld [vmem:[%s1423_s10 + $0xf8] sm:$0xff] }
  0x30   :  { %949 = vmatprep.subr.bf16.mxu0 %v948_v6  ;;  %v457_v6 = vld [vmem:[%s1423_s10 + $0x60] sm:$0xff]  ;;  %v1016_v11 = vpack.c.bf16 %v476_v10, %v475_v9  ;;  %v634_v44 = vld [vmem:[%s1421_s8 + $0x10] sm:$0xff]  ;;  %v639_v51 = vld [vmem:[%s1421_s8 + $0x38] sm:$0xff] }
  0x31   :  { %v1014_v8 = vpack.c.bf16 %v458_v7, %v457_v6  ;;  %v273_v19 = vld [vmem:[%s1420_s7] sm:$0x7]  ;;  %v638_v50 = vld [vmem:[%s1421_s8 + $0x30] sm:$0xff]  ;;  %v643_v57 = vld [vmem:[%s1421_s8 + $0x58] sm:$0xff] }
  0x32   :  { %979 = vmatpush3.bf16.msra.mxu1 %v976_v4  ;;  %v474_v4 = vld [vmem:[%s1423_s10 + $0xe8] sm:$0xff]  ;;  %v282_v24 = vrot.slane %v273_v19, %v281_v18  ;;  %v636_v47 = vld [vmem:[%s1421_s8 + $0x20] sm:$0xff]  ;;  %v1030_v52 = vpack.c.bf16 %v639_v51, %v638_v50  ;;  %v642_v56 = vld [vmem:[%s1421_s8 + $0x50] sm:$0xff] }
  0x33   :  { %951 = vmatpush1.bf16.msra.mxu0 %v950_v12  ;;  %981 = vmatprep.subr.bf16.mxu1 %v980_v13  ;;  %v1012_v5 = vpack.c.bf16 %v474_v4, %v473_v3  ;;  %v459_v12 = vld [vmem:[%s1423_s10 + $0x70] sm:$0xff]  ;;  %v640_v53 = vld [vmem:[%s1421_s8 + $0x40] sm:$0xff]  ;;  %v645_v60 = vld [vmem:[%s1421_s8 + $0x68] sm:$0xff] }
  0x34   :  { %953 = vmatprep.subr.bf16.mxu0 %v952_v14  ;;  %v644_v59 = vld [vmem:[%s1421_s8 + $0x60] sm:$0xff]  ;;  %v646_v7 = vld [vmem:[%s1421_s8 + $0x70] sm:$0xff] }
  0x36   :  { %983 = vmatpush3.bf16.msra.mxu1 %v980_v13  ;;  %v460_v13 = vld [vmem:[%s1423_s10 + $0x78] sm:$0xff] }
  0x37   :  { %955 = vmatpush1.bf16.msra.mxu0 %v954_v17  ;;  %985 = vmatprep.subr.bf16.mxu1 %v984_v20  ;;  %v1018_v14 = vpack.c.bf16 %v460_v13, %v459_v12  ;;  %v285_v17 = vsub.s32 2, %v276_v16  ;;  %v747_v13 = vld [vmem:[%s1422_s9] ss:$0 sm:$0xff] }
  0x38   :  { %989 = vmatprep.subr.bf16.mxu0 %v988_v23 }
  0x39   :  { %v286_v22 = vrot.slane %v273_v19, %v285_v17 }
  0x3a   :  { %987 = vmatpush3.bf16.msra.mxu1 %v984_v20  ;;  %v277_v20 = vsub.s32 0, %v276_v16 }
  0x3b   :  { %1020 = vmatprep.subr.bf16.mxu1 %v1106_v0 }
  0xed   :  { %v136_v29 = vpop.f32.mrb[0].mxu0 }
  0xee   :  { %v137_v31 = vadd.f32 %v741_v26, %v136_v29  ;;  %v833_v32 = vpop.f32.mrb[1].mxu0  ;;  %v278_v26 = vrot.slane %v273_v19, %v277_v20 }
  0xf0   :  { %v221_v39 = vpop.f32.mrb[0].mxu1  ;;  %355 = vmatmul.mubr.f32.vlgmr.msra.gmra.mrb[2].mxu0 %v137_v31  ;;  %875 = vmatprep.mubr.f32.mxu1 %v137_v31 }
  0xf1   :  { %v222_v40 = vadd.f32 %v743_v33, %v221_v39  ;;  %v842_v41 = vpop.f32.mrb[1].mxu1  ;;  %360 = vmatprep.mubr.f32.mxu0 %v1108_v1  ;;  %991 = vmatpush3.bf16.msra.mxu0 %v990_v30 }
  0xf2   :  { %993 = vmatprep.subr.bf16.mxu0 %v992_v34  ;;  %v553_v41 = vld [vmem:[%s1424_s11] sm:$0xff] }
  0xf3   :  { %876 = vmatmul.mubr.f32.vlgmr.msra.gmra.mrb[2].mxu1 %v222_v40 }
  0xf4   :  { %361 = vmatmul.mubr.f32.gmra.mrb[4].mxu0 %v222_v40  ;;  %915 = vmatprep.mubr.msk.f32.mxu1 %vm1107_vm0, %v1108_v1 }
  0xf5   :  { %995 = vmatpush3.bf16.msra.mxu0 %v994_v42  ;;  %v632_v42 = vld [vmem:[%s1421_s8] sm:$0xff] }
  0xf6   :  { %997 = vmatprep.subr.bf16.mxu0 %v996_v43  ;;  %v633_v43 = vld [vmem:[%s1421_s8 + $0x8] sm:$0xff] }
  0xf7   :  { %v1021_v45 = vpack.c.bf16 %v633_v43, %v632_v42 }
  0xf9   :  { %999 = vmatpush3.bf16.msra.mxu0 %v998_v48  ;;  %1022 = vmatpush3.bf16.msra.mxu1 %v1021_v45  ;;  %v637_v48 = vld [vmem:[%s1421_s8 + $0x28] sm:$0xff] }
  0xfa   :  { %1001 = vmatprep.subr.bf16.mxu0 %v1000_v49  ;;  %1023 = vmatprep.subr.bf16.mxu1 %v1106_v0  ;;  %v1027_v49 = vpack.c.bf16 %v637_v48, %v636_v47 }
  0xfd   :  { %1003 = vmatpush3.bf16.msra.mxu0 %v1002_v54  ;;  %v641_v54 = vld [vmem:[%s1421_s8 + $0x48] sm:$0xff] }
  0xfe   :  { %1005 = vmatprep.subr.bf16.mxu0 %v1004_v55  ;;  %v1033_v55 = vpack.c.bf16 %v641_v54, %v640_v53 }
 0x101   :  { %1007 = vmatpush3.bf16.msra.mxu0 %v1006_v58  ;;  %v1036_v58 = vpack.c.bf16 %v643_v57, %v642_v56 }
 0x102   :  { %1009 = vmatprep.subr.bf16.mxu0 %v1008_v61  ;;  %v1039_v61 = vpack.c.bf16 %v645_v60, %v644_v59 }
 0x105   :  { %1011 = vmatpush3.bf16.msra.mxu0 %v1010_v2 }
 0x106   :  { %1013 = vmatprep.subr.bf16.mxu0 %v1012_v5 }
 0x109   :  { %1015 = vmatpush3.bf16.msra.mxu0 %v1014_v8  ;;  %v647_v8 = vld [vmem:[%s1421_s8 + $0x78] sm:$0xff] }
 0x10a   :  { %1017 = vmatprep.subr.bf16.mxu0 %v1016_v11 }
 0x10d   :  { %1019 = vmatpush3.bf16.msra.mxu0 %v1018_v14 }
 0x10e   :  { %878 = vmatprep.subr.mxu0 %v1108_v1 }
 0x1c3   :  { %v356_v21 = vpop.f32.mrb[2].mxu0 }
 0x1c4   :  { %v358_v23 = vpop.f32.mrb[3].mxu0  ;;  %v357_v36 = vadd.f32 %v356_v21, %v278_v26 }
 0x1c5   :  { %v359_v32 = vadd.f32 %v358_v23, %v282_v24 }
 0x1c6   :  { %v877_v25 = vpop.f32.mrb[2].mxu1 }
 0x1c7   :  { %v1327_v27 = vadd.f32 %v877_v25, %v286_v22  ;;  %v362_v28 = vpop.f32.mrb[4].mxu0  ;;  %v433_v29 = vpop.f32.mrb[3].mxu1 }
 0x1c8   :  { %v1329_v30 = vadd.f32 %v433_v29, %v286_v22  ;;  %v364_v31 = vpop.f32.mrb[5].mxu0  ;;  %v363_v37 = vadd.f32 %v362_v28, %v278_v26 }
 0x1c9   :  { %v365_v33 = vadd.f32 %v364_v31, %v282_v24 }
 0x1ca   :  { %v1333_v34 = vadd.f32 %v1327_v27, %v1329_v30  ;;  %v629_v35 = vsub.f32 %v1329_v30, %v1327_v27 }
 0x1cb   :  { %v442_v38 = vsub.f32 %v359_v32, %v365_v33 }
 0x1cd   :  { %v443_v39 = vmul.f32 %v442_v38, %v357_v36  ;;  %v444_v40 = vmul.f32 %v442_v38, %v363_v37 }
 0x1cf   :  { %541 = vmatprep.mubr.f32.mxu0 %v444_v40 }
 0x1d0   :  { %542 = vmatmul.mubr.f32.vlgmr.msra.gmra.mrb[6].mxu0 %v443_v39 }
 0x1d1   :  { %880 = vmatprep.mubr.msk.f32.mxu0 %vm1107_vm0, %v1108_v1  ;;  %879 = vmatpush3.msra.mxu0 %v553_v41  ;;  %v635_v1 = vld [vmem:[%s1421_s8 + $0x18] sm:$0xff]  ;;  %s1077_s8 = scalar_lea.vmem %s733_s4, 128 }
 0x1d2   :  { %v1024_v46 = vpack.c.bf16 %v635_v1, %v634_v44  ;;  %p1078_p8 = scmp.ne.s32.totalorder %s733_s4, %s1077_s8  ;;  %p1083_p10 = scmp.lt.s32.totalorder %s1077_s8, %s1077_s8 }
 0x1d4   :  { %1025 = vmatpush3.bf16.msra.mxu1 %v1024_v46  ;;  %p1084_p11 = por %p1083_p10, %p1082_p9 }
 0x1d5   :  { %1026 = vmatprep.subr.bf16.mxu1 %v1106_v0 }
 0x1d6   :  { %p1085_p12 = pnand %p1084_p11, %p1078_p8 }
 0x1d8   :  { %1028 = vmatpush3.bf16.msra.mxu1 %v1027_v49 }
 0x1d9   :  { %1029 = vmatprep.subr.bf16.mxu1 %v1106_v0 }
 0x1dc   :  { %1031 = vmatpush3.bf16.msra.mxu1 %v1030_v52 }
 0x1dd   :  { %1032 = vmatprep.subr.bf16.mxu1 %v1106_v0 }
 0x1e0   :  { %1034 = vmatpush3.bf16.msra.mxu1 %v1033_v55 }
 0x1e1   :  { %1035 = vmatprep.subr.bf16.mxu1 %v1106_v0 }
 0x1e4   :  { %1037 = vmatpush3.bf16.msra.mxu1 %v1036_v58 }
 0x1e5   :  { %1038 = vmatprep.subr.bf16.mxu1 %v1106_v0 }
 0x1e8   :  { %1040 = vmatpush3.bf16.msra.mxu1 %v1039_v61 }
 0x1e9   :  { %1041 = vmatprep.subr.bf16.mxu1 %v1106_v0  ;;  %v1042_v0 = vpack.c.bf16 %v647_v8, %v646_v7 }
 0x1ec   :  { %1043 = vmatpush3.bf16.msra.mxu1 %v1042_v0 }
 0x2a3   :  { %v805_v62 = vpop.f32.mrb[6].mxu0 }
 0x2a4   :  { %v806_v63 = vpop.f32.mrb[7].mxu0 }
 0x2a5   :  { %v807_v2 = vadd.f32 %v806_v63, %v805_v62 }
 0x2a7   :  { %v745_v3 = vmul.f32 -1.442695, %v807_v2 }
 0x2a9   :  { %1051 = vpow2.f32 %v745_v3 }
 0x2b3   :  { %v1052_v4 = vpop.eup %1051 }
 0x2b4   :  { %v550_v5 = vadd.f32 1.0, %v1052_v4 }
 0x2b6   :  { %1053 = vrcp.f32 %v550_v5 }
 0x2c0   :  { %v1054_v6 = vpop.eup %1053 }
 0x2c1   :  { %881 = vmatmul.mubr.msk.f32.vlgmr.msra.gmra.mrb[8].mxu0 %vm554_vm3, %v1054_v6 }
 0x394   :  { %v624_v9 = vpop.f32.mrb[8].mxu0 }
 0x395   :  { %v630_v10 = vmul.f32 %v629_v35, %v624_v9  ;;  %v882_v11 = vpop.f32.mrb[9].mxu0 }
 0x397   :  { %v631_v12 = vadd.f32 %v630_v10, %v1333_v34 }
 0x399   :  { %916 = vmatmul.mubr.f32.vlgmr.msra.gmra.mrb[4].mxu1 %v631_v12 }
 0x46c   :  { %v721_v14 = vpop.f32.mrb[4].mxu1 }
 0x46d   :  { %v722_v15 = vadd.f32 %v747_v13, %v721_v14  ;;  %v917_v16 = vpop.f32.mrb[5].mxu1 }
 0x46f   :  { %725 = vst [vmem:[#allocation5] sm:$0xff] %v722_v15 }
 0x470   :  { %1088 = shalt.err (!%p1085_p12)
}
 0x471   :  { %s1089_s30 = scalar_lea.hbm %s1425_s12, 128 }
 0x472   :  { %p1090_p13 = scmp.ne.s32.totalorder %s1425_s12, %s1089_s30  ;;  %p1093_p0 = scmp.lt.u32.totalorder %s1089_s30, %s1425_s12 }
 0x474   :  { %p1095_p1 = pnand %p1093_p0, %p1090_p13 }
 0x476   :  { %1098 = shalt.err (!%p1095_p1)
}
 0x477   :  { %735 = dma.vmem_to_hbm [thread:$0]  %s733_s4, 128, %s1425_s12, [#allocation4]  }
 0x478   :  { %1101 = dma.done.wait [#allocation4], 128  }
 0x479   :  { %1102 = vsyncadd [#allocation4], 4294967168 }
 0x47a   :  { %739 = vsyncpa [#allocation3], 1 }
 0x47b   :  { %740 = vsyncpa [#allocation4], 1 }

</bundles_post_ra>
